<compile_context>
chip_gen: v7x
topology: tpu7x:2x2x1
jax: 0.10.0
libtpu: 0.0.40
codegen_flags: <defaults>
</compile_context>

<pallas_src>
import functools

import jax
import jax.numpy as jnp
from jax import lax
from jax.experimental import pallas as pl
from jax.experimental.pallas import tpu as pltpu


def _round_up(x, m):
    return (x + m - 1) // m * m


def _largest_divisor_leq(n, cap):
    cap = max(1, min(int(cap), int(n)))
    for d in range(cap, 0, -1):
        if n % d == 0:
            return d
    return 1


# ----------------------------------------------------------------------------
# Kernel 1: hoisted input projection  xw = x @ W_ih^T   (one big MXU GEMM)
# ----------------------------------------------------------------------------
def _input_proj_kernel(x_ref, wih_ref, xw_ref):
    """x_ref: (tproj*B_pad, D) bf16, wih_ref: (D, 4H_pad) bf16,
    xw_ref: (tproj*B_pad, 4H_pad) bf16 (f32 accumulation, bf16 store)."""
    xw_ref[...] = jnp.dot(
        x_ref[...], wih_ref[...], preferred_element_type=jnp.float32
    ).astype(xw_ref.dtype)


# ----------------------------------------------------------------------------
# Kernel 2: serial LSTM recurrence (state in VMEM scratch) + FC/sigmoid epilogue
# ----------------------------------------------------------------------------
def _lstm_recurrence_kernel(xw_ref, whh_ref, b_ref, wfc_ref, bfc_ref,
                            out_ref, h_scr, c_scr,
                            *, t_tile, h_pad, last_valid):
    """Grid = (batch_tiles [parallel], time_chunks [arbitrary, serial]).

    xw_ref  : (t_tile, B_tile, 4*H_pad) bf16   streamed x@W_ih^T chunk
    whh_ref : (H_pad, 4*H_pad)          bf16   resident
    b_ref   : (1, 4*H_pad)              f32    combined bias (b_ih + b_hh)
    wfc_ref : (1, H_pad)                f32    fc weight row (zero-padded)
    bfc_ref : (1, 1)                    f32
    out_ref : (B_tile, 1)               f32    sigmoid(fc(h_T))
    h_scr, c_scr : (B_tile, H_pad) f32         recurrent state across chunks
    """
    t_idx = pl.program_id(1)
    n_chunks = pl.num_programs(1)

    @pl.when(t_idx == 0)
    def _init():
        h_scr[...] = jnp.zeros_like(h_scr)
        c_scr[...] = jnp.zeros_like(c_scr)

    whh = whh_ref[...]
    bias = b_ref[...]

    def step_fn(masked):
        def step(tt, carry):
            h, c = carry
            gates = (xw_ref[tt].astype(jnp.float32) + bias
                     + jnp.dot(h.astype(jnp.bfloat16), whh,
                               preferred_element_type=jnp.float32))
            # Lane-aligned gate views (each gate spans exactly H_pad = k*128 lanes).
            i_g = jax.nn.sigmoid(gates[:, 0 * h_pad:1 * h_pad])
            f_g = jax.nn.sigmoid(gates[:, 1 * h_pad:2 * h_pad])
            g_g = jnp.tanh(gates[:, 2 * h_pad:3 * h_pad])
            o_g = jax.nn.sigmoid(gates[:, 3 * h_pad:4 * h_pad])
            c_new = f_g * c + i_g * g_g
            h_new = o_g * jnp.tanh(c_new)
            if masked:  # only compiled into the last-chunk body
                valid = tt < last_valid
                h_new = jnp.where(valid, h_new, h)
                c_new = jnp.where(valid, c_new, c)
            return h_new, c_new
        return step

    def run_chunk(masked):
        h_f, c_f = lax.fori_loop(0, t_tile, step_fn(masked),
                                 (h_scr[...], c_scr[...]),
                                 unroll=min(t_tile, 8))
        h_scr[...] = h_f
        c_scr[...] = c_f

    if last_valid == t_tile:
        # T divides evenly into chunks: no masking anywhere (hot path).
        run_chunk(masked=False)
    else:
        @pl.when(t_idx < n_chunks - 1)
        def _hot():
            run_chunk(masked=False)

        @pl.when(t_idx == n_chunks - 1)
        def _tail():
            run_chunk(masked=True)   # mask only the padded tail timesteps

    @pl.when(t_idx == n_chunks - 1)
    def _finish():
        # FC as VPU broadcast-multiply + lane reduction (avoids an N=1 MXU matmul).
        logits = (jnp.sum(h_scr[...] * wfc_ref[...], axis=-1, keepdims=True)
                  + bfc_ref[...])
        out_ref[...] = jax.nn.sigmoid(logits)


# ----------------------------------------------------------------------------
# Wrapper
# ----------------------------------------------------------------------------
def lstm_discriminator_forward(x_btd, w_ih, w_hh, b_ih, b_hh, w_fc, b_fc):
    """x_btd: (B, T, D) batch_first input (PyTorch convention).

    w_ih: (4H, D), w_hh: (4H, H), b_ih/b_hh: (4H,), w_fc: (1, H), b_fc: (1,)
    Returns (B, 1) float32.
    """
    B, T, D = x_btd.shape
    H4 = w_ih.shape[0]
    H = H4 // 4

    # ---- padded sizes -------------------------------------------------------
    H_pad = _round_up(max(H, 128), 128)      # lane-align each gate block
    G_pad = 4 * H_pad
    B_pad = _round_up(max(B, 8), 8)          # sublane-align batch
    if B_pad <= 64:
        B_tile = B_pad                       # <=64 keeps per-step vregs bounded
    else:
        B_tile = max(d for d in range(8, 65, 8) if B_pad % d == 0)
    n_btiles = B_pad // B_tile

    # ---- VMEM-capacity-aware time tiling ------------------------------------
    try:
        vmem_cap = int(pltpu.get_tpu_info().vmem_capacity_bytes)
    except Exception:
        vmem_cap = 64 * 1024 * 1024          # safe lower bound (v7x)
    budget = min(int(0.55 * vmem_cap), 100 * 1024 * 1024)

    # Recurrence-kernel resident bytes (worst case: weights double-buffered).
    resident = (2 * (H_pad * G_pad * 2 + G_pad * 4 + H_pad * 4 + 4)
                + 2 * B_tile * H_pad * 4 + 2 * B_tile * 4)
    per_step = 2 * B_tile * G_pad * 2        # 2 pipeline buffers, bf16, per timestep
    t_max = int(max(1, min((budget - resident) // per_step, 256)))

    # Prefer a tile that divides T so no tail masking is needed.
    t_cap = max(1, min(t_max, T))
    best_div = _largest_divisor_leq(T, t_cap)
    t_tile = best_div if best_div * 4 >= t_cap else t_cap
    T_pad = _round_up(T, t_tile)
    n_chunks = T_pad // t_tile
    last_valid = T - (n_chunks - 1) * t_tile      # valid steps in the last chunk

    # Projection-kernel time tile (its output slab is the big VMEM consumer).
    tproj_cap = max(1, (budget - 4 * D * G_pad) // (4 * B_pad * (D + G_pad)))
    tproj = _largest_divisor_leq(T_pad, min(t_tile, tproj_cap))

    # ---- layout glue (transpose/pad/cast only; all compute in the kernels) ---
    x_tbd = jnp.transpose(x_btd, (1, 0, 2))                        # (T, B, D)
    x_tbd = jnp.pad(x_tbd, ((0, T_pad - T), (0, B_pad - B), (0, 0)))
    x2d = x_tbd.reshape(T_pad * B_pad, D).astype(jnp.bfloat16)     # (T_pad*B_pad, D)

    def pad_gates(w_t, rows_pad):
        # w_t: (rows, 4H) gate order i,f,g,o -> (rows_pad, 4H_pad); each gate
        # zero-padded H -> H_pad.  Padding is numerically exact: padded gate
        # pre-activations are 0 and h/c start at 0, so padded h/c stay 0.
        rows = w_t.shape[0]
        parts = [jnp.pad(w_t[:, g * H:(g + 1) * H],
                         ((0, rows_pad - rows), (0, H_pad - H)))
                 for g in range(4)]
        return jnp.concatenate(parts, axis=1)

    wih_t = pad_gates(jnp.transpose(w_ih), D).astype(jnp.bfloat16)      # (D, G_pad)
    whh_t = pad_gates(jnp.transpose(w_hh), H_pad).astype(jnp.bfloat16)  # (H_pad, G_pad)
    bias = pad_gates((b_ih + b_hh).reshape(1, 4 * H), 1).astype(jnp.float32)
    wfc_row = jnp.pad(w_fc.reshape(1, H),
                      ((0, 0), (0, H_pad - H))).astype(jnp.float32)     # (1, H_pad)
    bfc = b_fc.reshape(1, 1).astype(jnp.float32)

    # ---- per-call VMEM limits from actual footprints -------------------------
    proj_bytes = (2 * tproj * B_pad * D * 2            # x blocks (bf16, 2 bufs)
                  + 2 * tproj * B_pad * G_pad * 2      # xw blocks (bf16, 2 bufs)
                  + 2 * D * G_pad * 2)                 # W_ih^T
    rec_bytes = (2 * t_tile * B_tile * G_pad * 2       # xw chunk (bf16, 2 bufs)
                 + 2 * (H_pad * G_pad * 2 + G_pad * 4 + H_pad * 4 + 4)
                 + 2 * B_tile * H_pad * 4              # h, c scratch
                 + 2 * B_tile * 4)                     # output

    def vmem_limit(nbytes):
        return int(min(max(2 * nbytes, 8 * 1024 * 1024), int(0.8 * vmem_cap)))

    rec_kernel = functools.partial(
        _lstm_recurrence_kernel,
        t_tile=t_tile, h_pad=H_pad, last_valid=last_valid)

    def run(single_buffer_weights):
        def resident_spec(shape):
            # Constant-index blocks never re-fetch; single-buffer them to save VMEM.
            if single_buffer_weights:
                return pl.BlockSpec(shape, lambda *_: (0,) * len(shape),
                                    pipeline_mode=pl.Buffered(1))
            return pl.BlockSpec(shape, lambda *_: (0,) * len(shape))

        # --- Kernel 1: input projection, one MXU-efficient GEMM over all T ---
        xw2d = pl.pallas_call(
            _input_proj_kernel,
            out_shape=jax.ShapeDtypeStruct((T_pad * B_pad, G_pad), jnp.bfloat16),
            grid_spec=pltpu.PrefetchScalarGridSpec(
                num_scalar_prefetch=0,
                grid=(T_pad // tproj,),
                in_specs=[
                    pl.BlockSpec((tproj * B_pad, D), lambda t: (t, 0)),
                    resident_spec((D, G_pad)),
                ],
                out_specs=pl.BlockSpec((tproj * B_pad, G_pad), lambda t: (t, 0)),
            ),
            compiler_params=pltpu.CompilerParams(
                dimension_semantics=("parallel",),
                vmem_limit_bytes=vmem_limit(proj_bytes)),
        )(x2d, wih_t)

        # (T_pad*B_pad, G_pad) -> (T_pad, B_pad, G_pad): pure metadata reshape.
        xw = xw2d.reshape(T_pad, B_pad, G_pad)

        # --- Kernel 2: serial recurrence + FC epilogue; xw chunks streamed ---
        out_pad = pl.pallas_call(
            rec_kernel,
            out_shape=jax.ShapeDtypeStruct((B_pad, 1), jnp.float32),
            grid_spec=pltpu.PrefetchScalarGridSpec(
                num_scalar_prefetch=0,
                grid=(n_btiles, n_chunks),
                in_specs=[
                    pl.BlockSpec((t_tile, B_tile, G_pad), lambda b, t: (t, b, 0)),
                    resident_spec((H_pad, G_pad)),   # W_hh^T
                    resident_spec((1, G_pad)),       # combined bias (f32)
                    resident_spec((1, H_pad)),       # fc weight row
                    resident_spec((1, 1)),           # fc bias
                ],
                out_specs=pl.BlockSpec((B_tile, 1), lambda b, t: (b, 0)),
                scratch_shapes=[
                    pltpu.VMEM((B_tile, H_pad), jnp.float32),   # h
                    pltpu.VMEM((B_tile, H_pad), jnp.float32),   # c
                ],
            ),
            compiler_params=pltpu.CompilerParams(
                dimension_semantics=("parallel", "arbitrary"),
                vmem_limit_bytes=vmem_limit(rec_bytes)),
        )(xw, whh_t, bias, wfc_row, bfc)
        return out_pad

    try:
        out_pad = jax.block_until_ready(run(single_buffer_weights=True))
    except Exception:
        # pl.Buffered(1) on resident weights unsupported by this jax build /
        # backend -> fall back to default double-buffering (correctness identical).
        out_pad = jax.block_until_ready(run(single_buffer_weights=False))

    return out_pad[:B]


# ----------------------------------------------------------------------------
# Pure-JAX f32 reference matching PyTorch nn.LSTM semantics
# ----------------------------------------------------------------------------
def _reference_forward(x_btd, w_ih, w_hh, b_ih, b_hh, w_fc, b_fc):
    B, T, D = x_btd.shape
    H = w_hh.shape[1]
    h = jnp.zeros((B, H), jnp.float32)
    c = jnp.zeros((B, H), jnp.float32)
    for t in range(T):
        gates = x_btd[:, t] @ w_ih.T + b_ih + h @ w_hh.T + b_hh
        i = jax.nn.sigmoid(gates[:, 0:H])
        f = jax.nn.sigmoid(gates[:, H:2 * H])
        g = jnp.tanh(gates[:, 2 * H:3 * H])
        o = jax.nn.sigmoid(gates[:, 3 * H:4 * H])
        c = f * c + i * g
        h = o * jnp.tanh(c)
    return jax.nn.sigmoid(h @ w_fc.T + b_fc)


if __name__ == "__main__":
    # Small shapes: batch=2, seq=8, input_dim=16, hidden_dim=32
    B, T, D, H = 2, 8, 16, 32

    key = jax.random.PRNGKey(0)
    ks = jax.random.split(key, 7)
    bound = 1.0 / float(jnp.sqrt(jnp.float32(H)))

    x = jax.random.normal(ks[0], (B, T, D), jnp.float32)
    w_ih = jax.random.uniform(ks[1], (4 * H, D), jnp.float32, -bound, bound)
    w_hh = jax.random.uniform(ks[2], (4 * H, H), jnp.float32, -bound, bound)
    b_ih = jax.random.uniform(ks[3], (4 * H,), jnp.float32, -bound, bound)
    b_hh = jax.random.uniform(ks[4], (4 * H,), jnp.float32, -bound, bound)
    w_fc = jax.random.uniform(ks[5], (1, H), jnp.float32, -bound, bound)
    b_fc = jax.random.uniform(ks[6], (1,), jnp.float32, -bound, bound)

    out = lstm_discriminator_forward(x, w_ih, w_hh, b_ih, b_hh, w_fc, b_fc)
    out = jax.block_until_ready(out)

    ref = _reference_forward(x, w_ih, w_hh, b_ih, b_hh, w_fc, b_fc)
    assert out.shape == (B, 1)
    # bf16 matmul inputs + bf16 xw staging (f32 accumulation everywhere) ->
    # loosened tolerance vs the pure-f32 reference.
    assert jnp.allclose(out, ref, atol=3e-2, rtol=3e-2), (out, ref)

    print("KERNEL_OK")
</pallas_src>

<mosaic_0001>
module attributes {stable_mosaic.version = 11 : i64} {
  func.func @_input_proj_kernel(%arg0: i32, %arg1: memref<64x16xbf16, #tpu.memory_space<vmem>>, %arg2: memref<16x512xbf16, #tpu.memory_space<vmem>>, %arg3: memref<64x512xbf16, #tpu.memory_space<vmem>>) attributes {dimension_semantics = [#tpu.dimension_semantics<parallel>], iteration_bounds = array<i64: 1>, scalar_prefetch = 0 : i64, scratch_operands = 0 : i64, tpu.core_type = #tpu.core_type<tc>, window_params = [{transform_indices = @transform_0, window_bounds = array<i64: 64, 16>}, {pipeline_mode = #tpu.pipeline_mode<synchronous>, transform_indices = @transform_1, window_bounds = array<i64: 16, 512>}, {transform_indices = @transform_2, window_bounds = array<i64: 64, 512>}]} {
    %c0 = arith.constant 0 : index
    %c0_0 = arith.constant 0 : index
    %0 = vector.load %arg1[%c0, %c0_0] : memref<64x16xbf16, #tpu.memory_space<vmem>>, vector<64x16xbf16>
    %c0_1 = arith.constant 0 : index
    %c0_2 = arith.constant 0 : index
    %1 = vector.load %arg2[%c0_1, %c0_2] : memref<16x512xbf16, #tpu.memory_space<vmem>>, vector<16x512xbf16>
    %cst = arith.constant dense<0.000000e+00> : vector<64x512xf32>
    %2 = tpu.matmul %0, %1, %cst {dimension_numbers = #tpu.dot_dimension_numbers<[1], [0], [0], [1], [0, 0, 1, 1], [], []>} : vector<64x16xbf16>, vector<16x512xbf16>, vector<64x512xf32> -> vector<64x512xf32>
    %3 = arith.truncf %2 : vector<64x512xf32> to vector<64x512xbf16>
    %c0_3 = arith.constant 0 : index
    %c0_4 = arith.constant 0 : index
    %4 = vector.load %arg3[%c0_3, %c0_4] : memref<64x512xbf16, #tpu.memory_space<vmem>>, vector<64x512xbf16>
    tpu.vector_store %arg3[%c0_3, %c0_4], %3 {strides = array<i32>} : memref<64x512xbf16, #tpu.memory_space<vmem>>, vector<64x512xbf16>,
    return
  }
  func.func @transform_0(%arg0: i32) -> (i32, i32) {
    %c0_i32 = arith.constant 0 : i32
    %c0_i32_0 = arith.constant 0 : i32
    return %arg0, %c0_i32 : i32, i32
  }
  func.func @transform_1(%arg0: i32) -> (i32, i32) {
    %c0_i32 = arith.constant 0 : i32
    %c0_i32_0 = arith.constant 0 : i32
    %c0_i32_1 = arith.constant 0 : i32
    return %c0_i32, %c0_i32_0 : i32, i32
  }
  func.func @transform_2(%arg0: i32) -> (i32, i32) {
    %c0_i32 = arith.constant 0 : i32
    %c0_i32_0 = arith.constant 0 : i32
    return %arg0, %c0_i32 : i32, i32
  }
}

module attributes {stable_mosaic.version = 11 : i64} {
  func.func @_input_proj_kernel(%arg0: i32, %arg1: memref<64x16xbf16, #tpu.memory_space<vmem>>, %arg2: memref<16x512xbf16, #tpu.memory_space<vmem>>, %arg3: memref<64x512xbf16, #tpu.memory_space<vmem>>) attributes {dimension_semantics = [#tpu.dimension_semantics<parallel>], iteration_bounds = array<i64: 1>, scalar_prefetch = 0 : i64, scratch_operands = 0 : i64, tpu.core_type = #tpu.core_type<tc>, window_params = [{transform_indices = @transform_0, window_bounds = array<i64: 64, 16>}, {pipeline_mode = #tpu.pipeline_mode<synchronous>, transform_indices = @transform_1, window_bounds = array<i64: 16, 512>}, {transform_indices = @transform_2, window_bounds = array<i64: 64, 512>}]} {
    %c0 = arith.constant 0 : index
    %c0_0 = arith.constant 0 : index
    %0 = vector.load %arg1[%c0, %c0_0] : memref<64x16xbf16, #tpu.memory_space<vmem>>, vector<64x16xbf16>
    %c0_1 = arith.constant 0 : index
    %c0_2 = arith.constant 0 : index
    %1 = vector.load %arg2[%c0_1, %c0_2] : memref<16x512xbf16, #tpu.memory_space<vmem>>, vector<16x512xbf16>
    %cst = arith.constant dense<0.000000e+00> : vector<64x512xf32>
    %2 = tpu.matmul %0, %1, %cst {dimension_numbers = #tpu.dot_dimension_numbers<[1], [0], [0], [1], [0, 0, 1, 1], [], []>} : vector<64x16xbf16>, vector<16x512xbf16>, vector<64x512xf32> -> vector<64x512xf32>
    %3 = arith.truncf %2 : vector<64x512xf32> to vector<64x512xbf16>
    %c0_3 = arith.constant 0 : index
    %c0_4 = arith.constant 0 : index
    %4 = vector.load %arg3[%c0_3, %c0_4] : memref<64x512xbf16, #tpu.memory_space<vmem>>, vector<64x512xbf16>
    tpu.vector_store %arg3[%c0_3, %c0_4], %3 {strides = array<i32>} : memref<64x512xbf16, #tpu.memory_space<vmem>>, vector<64x512xbf16>,
    return
  }
  func.func @transform_0(%arg0: i32) -> (i32, i32) {
    %c0_i32 = arith.constant 0 : i32
    %c0_i32_0 = arith.constant 0 : i32
    return %arg0, %c0_i32 : i32, i32
  }
  func.func @transform_1(%arg0: i32) -> (i32, i32) {
    %c0_i32 = arith.constant 0 : i32
    %c0_i32_0 = arith.constant 0 : i32
    %c0_i32_1 = arith.constant 0 : i32
    return %c0_i32, %c0_i32_0 : i32, i32
  }
  func.func @transform_2(%arg0: i32) -> (i32, i32) {
    %c0_i32 = arith.constant 0 : i32
    %c0_i32_0 = arith.constant 0 : i32
    return %arg0, %c0_i32 : i32, i32
  }
}

</mosaic_0001>

<bundles_post_ra>
// kernel: tpu_custom_call.1
= control target key start
LH: loop header
LB: loop body
LE: loop exit
PB: predicated region body
PF: predicated region fallthrough
CT: control target
= control target key end

     0   :  { %v438_v2 = vmov 0   ;;  %vm65_vm0 = vcmask 130048   ;;  %s501_s0 = inlined_call_operand.vmem [shape: bf16[64,16], index: 0, kind: input, shape index: {}]   ;;  %s502_s1 = inlined_call_operand.vmem [shape: bf16[16,512], index: 1, kind: input, shape index: {}]   ;;  %s503_s2 = inlined_call_operand.hbm [shape: bf16[64,512], index: 2, kind: output, shape index: {}]  }
   0x1   :  { %v404_v0 = vld [vmem:[%s502_s1 + $0x4] ss:$16 sps:$4 sm:$0xff]   ;;  %v406_v1 = vld [vmem:[%s502_s1 + $0xc] ss:$16 sps:$4 sm:$0xff]   ;;  %110 = vmatprep.mubr.bf16.mxu0 %v438_v2  ;;  %183 = vmatprep.mubr.bf16.mxu1 %v438_v2  ;;  %v408_v3 = vld [vmem:[%s502_s1] ss:$16 sps:$4 sm:$0xff]  }
   0x2   :  { %78 = vmatprep.subr.bf16.mxu0 %v404_v0  ;;  %v409_v4 = vld [vmem:[%s502_s1 + $0x8] ss:$16 sps:$4 sm:$0xff]   ;;  %151 = vmatprep.subr.bf16.mxu1 %v406_v1  ;;  %v410_v5 = vld [vmem:[%s501_s0] sm:$0xff]  }
   0x3   :  { %79 = vmatpush1.bf16.msra.mxu0 %v408_v3  ;;  %152 = vmatpush1.bf16.msra.mxu1 %v409_v4 }
   0x4   :  { %7 = vsyncpa [#allocation3], 0  ;;  %v411_v6 = vld [vmem:[%s501_s0 + $0x8] sm:$0xff]   ;;  %v412_v7 = vld [vmem:[%s501_s0 + $0x10] sm:$0xff]  }
   0x5   :  { %v413_v8 = vld [vmem:[%s501_s0 + $0x18] sm:$0xff]   ;;  %s439_s0 = smov [#allocation2]  }
   0x6   :  { %360 = vmatmul.mubr.msk.bf16.vlgmr.msra.gmra.mrb[0].mxu0 %vm65_vm0, %v410_v5  ;;  %364 = vmatmul.mubr.msk.bf16.vlgmr.msra.gmra.mrb[0].mxu1 %vm65_vm0, %v410_v5  ;;  %s341_s24 = sshll.u32 %s439_s0, 4  ;;  %s342_s24 = int_to_ptr.vmem [resolvable:$true] %s341_s24 }
   0x7   :  { %120 = vmatprep.mubr.bf16.mxu0 %v438_v2  ;;  %193 = vmatprep.mubr.bf16.mxu1 %v438_v2  ;;  %s414_s25 = scalar_lea.vmem %s342_s24, 2048  ;;  %p419_p1 = scmp.lt.s32.totalorder %s342_s24, %s342_s24 }
   0x8   :  { %p415_p0 = scmp.ne.s32.totalorder %s342_s24, %s414_s25  ;;  %p420_p2 = scmp.lt.s32.totalorder %s414_s25, %s414_s25 }
   0xa   :  { %p421_p3 = por %p420_p2, %p419_p1 }
   0xc   :  { %p422_p4 = pnand %p421_p3, %p415_p0 }
   0xe   :  { %361 = vmatmul.mubr.msk.bf16.gmra.mrb[4].mxu0 %vm65_vm0, %v411_v6  ;;  %365 = vmatmul.mubr.msk.bf16.gmra.mrb[4].mxu1 %vm65_vm0, %v411_v6 }
   0xf   :  { %130 = vmatprep.mubr.bf16.mxu0 %v438_v2  ;;  %203 = vmatprep.mubr.bf16.mxu1 %v438_v2 }
  0x16   :  { %362 = vmatmul.mubr.msk.bf16.gmra.mrb[8].mxu0 %vm65_vm0, %v412_v7  ;;  %366 = vmatmul.mubr.msk.bf16.gmra.mrb[8].mxu1 %vm65_vm0, %v412_v7 }
  0x17   :  { %140 = vmatprep.mubr.bf16.mxu0 %v438_v2  ;;  %213 = vmatprep.mubr.bf16.mxu1 %v438_v2 }
  0x1e   :  { %363 = vmatmul.mubr.msk.bf16.gmra.mrb[12].mxu0 %vm65_vm0, %v413_v8  ;;  %367 = vmatmul.mubr.msk.bf16.gmra.mrb[12].mxu1 %vm65_vm0, %v413_v8 }
  0xd9   :  { %v112_v9 = vpop.f32.mrb[0].mxu0  ;;  %v185_v10 = vpop.f32.mrb[0].mxu1 }
  0xda   :  { %v114_v11 = vpop.f32.mrb[1].mxu0  ;;  %v187_v12 = vpop.f32.mrb[1].mxu1 }
  0xdb   :  { %v384_v13 = vpack.c.bf16 %v114_v11, %v112_v9  ;;  %v385_v14 = vpack.c.bf16 %v187_v12, %v185_v10  ;;  %v116_v15 = vpop.f32.mrb[2].mxu0  ;;  %v189_v16 = vpop.f32.mrb[2].mxu1 }
  0xdc   :  { %v118_v17 = vpop.f32.mrb[3].mxu0  ;;  %v191_v18 = vpop.f32.mrb[3].mxu1 }
  0xdd   :  { %320 = vst [vmem:[#allocation2] sm:$0xff] %v384_v13  ;;  %321 = vst [vmem:[#allocation2 + $0x8] sm:$0xff] %v385_v14  ;;  %v386_v19 = vpack.c.bf16 %v118_v17, %v116_v15  ;;  %v387_v20 = vpack.c.bf16 %v191_v18, %v189_v16 }
  0xdf   :  { %322 = vst [vmem:[#allocation2 + $0x10] sm:$0xff] %v386_v19  ;;  %323 = vst [vmem:[#allocation2 + $0x18] sm:$0xff] %v387_v20 }
  0xe1   :  { %v122_v21 = vpop.f32.mrb[4].mxu0  ;;  %v195_v22 = vpop.f32.mrb[4].mxu1 }
  0xe2   :  { %v124_v23 = vpop.f32.mrb[5].mxu0  ;;  %v197_v24 = vpop.f32.mrb[5].mxu1 }
  0xe3   :  { %v388_v25 = vpack.c.bf16 %v124_v23, %v122_v21  ;;  %v389_v26 = vpack.c.bf16 %v197_v24, %v195_v22  ;;  %v126_v27 = vpop.f32.mrb[6].mxu0  ;;  %v199_v28 = vpop.f32.mrb[6].mxu1 }
  0xe4   :  { %v128_v29 = vpop.f32.mrb[7].mxu0  ;;  %v201_v30 = vpop.f32.mrb[7].mxu1 }
  0xe5   :  { %324 = vst [vmem:[#allocation2 + $0x20] sm:$0xff] %v388_v25  ;;  %325 = vst [vmem:[#allocation2 + $0x28] sm:$0xff] %v389_v26  ;;  %v390_v31 = vpack.c.bf16 %v128_v29, %v126_v27  ;;  %v391_v32 = vpack.c.bf16 %v201_v30, %v199_v28 }
  0xe7   :  { %326 = vst [vmem:[#allocation2 + $0x30] sm:$0xff] %v390_v31  ;;  %327 = vst [vmem:[#allocation2 + $0x38] sm:$0xff] %v391_v32 }
  0xe9   :  { %v132_v33 = vpop.f32.mrb[8].mxu0  ;;  %v205_v34 = vpop.f32.mrb[8].mxu1 }
  0xea   :  { %v134_v35 = vpop.f32.mrb[9].mxu0  ;;  %v207_v36 = vpop.f32.mrb[9].mxu1 }
  0xeb   :  { %v392_v37 = vpack.c.bf16 %v134_v35, %v132_v33  ;;  %v393_v38 = vpack.c.bf16 %v207_v36, %v205_v34  ;;  %v136_v39 = vpop.f32.mrb[10].mxu0  ;;  %v209_v40 = vpop.f32.mrb[10].mxu1 }
  0xec   :  { %v138_v41 = vpop.f32.mrb[11].mxu0  ;;  %v211_v42 = vpop.f32.mrb[11].mxu1 }
  0xed   :  { %328 = vst [vmem:[#allocation2 + $0x40] sm:$0xff] %v392_v37  ;;  %329 = vst [vmem:[#allocation2 + $0x48] sm:$0xff] %v393_v38  ;;  %v394_v43 = vpack.c.bf16 %v138_v41, %v136_v39  ;;  %v395_v44 = vpack.c.bf16 %v211_v42, %v209_v40 }
  0xef   :  { %330 = vst [vmem:[#allocation2 + $0x50] sm:$0xff] %v394_v43  ;;  %331 = vst [vmem:[#allocation2 + $0x58] sm:$0xff] %v395_v44 }
  0xf1   :  { %v142_v45 = vpop.f32.mrb[12].mxu0  ;;  %v215_v46 = vpop.f32.mrb[12].mxu1 }
  0xf2   :  { %v144_v47 = vpop.f32.mrb[13].mxu0  ;;  %v217_v48 = vpop.f32.mrb[13].mxu1 }
  0xf3   :  { %v396_v49 = vpack.c.bf16 %v144_v47, %v142_v45  ;;  %v397_v50 = vpack.c.bf16 %v217_v48, %v215_v46  ;;  %v146_v51 = vpop.f32.mrb[14].mxu0  ;;  %v219_v52 = vpop.f32.mrb[14].mxu1 }
  0xf4   :  { %v148_v53 = vpop.f32.mrb[15].mxu0  ;;  %v221_v54 = vpop.f32.mrb[15].mxu1 }
  0xf5   :  { %332 = vst [vmem:[#allocation2 + $0x60] sm:$0xff] %v396_v49  ;;  %333 = vst [vmem:[#allocation2 + $0x68] sm:$0xff] %v397_v50  ;;  %v398_v55 = vpack.c.bf16 %v148_v53, %v146_v51  ;;  %v399_v56 = vpack.c.bf16 %v221_v54, %v219_v52 }
  0xf7   :  { %334 = vst [vmem:[#allocation2 + $0x70] sm:$0xff] %v398_v55  ;;  %335 = vst [vmem:[#allocation2 + $0x78] sm:$0xff] %v399_v56 }
  0xf8   :  { %425 = shalt.err (!%p422_p4)
}
  0xf9   :  { %s426_s28 = scalar_lea.hbm %s503_s2, 2048 }
  0xfa   :  { %p427_p5 = scmp.ne.s32.totalorder %s503_s2, %s426_s28  ;;  %p430_p6 = scmp.lt.u32.totalorder %s426_s28, %s503_s2 }
  0xfc   :  { %p432_p7 = pnand %p430_p6, %p427_p5 }
  0xfe   :  { %435 = shalt.err (!%p432_p7)
}
  0xff   :  { %s440_s5 = smov 256   ;;  %s441_s6 = smov 16  }
 0x100   :  { %347 = dma.vmem_to_hbm [thread:$0]  %s342_s24, 2048, %s503_s2, [#allocation3], %s440_s5, %s440_s5, %s441_s6  }
 0x101   :  { %436 = dma.done.wait [#allocation3], 2048  }
 0x102   :  { %437 = vsyncadd [#allocation3], 4294965248 }
 0x103   :  { %351 = vsyncpa [#allocation3], 1 }

// kernel: tpu_custom_call.1
= control target key start
LH: loop header
LB: loop body
LE: loop exit
PB: predicated region body
PF: predicated region fallthrough
CT: control target
= control target key end

     0   :  { %v438_v2 = vmov 0   ;;  %vm65_vm0 = vcmask 130048   ;;  %s501_s0 = inlined_call_operand.vmem [shape: bf16[64,16], index: 0, kind: input, shape index: {}]   ;;  %s502_s1 = inlined_call_operand.vmem [shape: bf16[16,512], index: 1, kind: input, shape index: {}]   ;;  %s503_s2 = inlined_call_operand.hbm [shape: bf16[64,512], index: 2, kind: output, shape index: {}]  }
   0x1   :  { %v404_v0 = vld [vmem:[%s502_s1 + $0x4] ss:$16 sps:$4 sm:$0xff]   ;;  %v406_v1 = vld [vmem:[%s502_s1 + $0xc] ss:$16 sps:$4 sm:$0xff]   ;;  %110 = vmatprep.mubr.bf16.mxu0 %v438_v2  ;;  %183 = vmatprep.mubr.bf16.mxu1 %v438_v2  ;;  %v408_v3 = vld [vmem:[%s502_s1] ss:$16 sps:$4 sm:$0xff]  }
   0x2   :  { %78 = vmatprep.subr.bf16.mxu0 %v404_v0  ;;  %v409_v4 = vld [vmem:[%s502_s1 + $0x8] ss:$16 sps:$4 sm:$0xff]   ;;  %151 = vmatprep.subr.bf16.mxu1 %v406_v1  ;;  %v410_v5 = vld [vmem:[%s501_s0] sm:$0xff]  }
   0x3   :  { %79 = vmatpush1.bf16.msra.mxu0 %v408_v3  ;;  %152 = vmatpush1.bf16.msra.mxu1 %v409_v4 }
   0x4   :  { %7 = vsyncpa [#allocation3], 0  ;;  %v411_v6 = vld [vmem:[%s501_s0 + $0x8] sm:$0xff]   ;;  %v412_v7 = vld [vmem:[%s501_s0 + $0x10] sm:$0xff]  }
   0x5   :  { %v413_v8 = vld [vmem:[%s501_s0 + $0x18] sm:$0xff]   ;;  %s439_s0 = smov [#allocation2]  }
   0x6   :  { %360 = vmatmul.mubr.msk.bf16.vlgmr.msra.gmra.mrb[0].mxu0 %vm65_vm0, %v410_v5  ;;  %364 = vmatmul.mubr.msk.bf16.vlgmr.msra.gmra.mrb[0].mxu1 %vm65_vm0, %v410_v5  ;;  %s341_s24 = sshll.u32 %s439_s0, 4  ;;  %s342_s24 = int_to_ptr.vmem [resolvable:$true] %s341_s24 }
   0x7   :  { %120 = vmatprep.mubr.bf16.mxu0 %v438_v2  ;;  %193 = vmatprep.mubr.bf16.mxu1 %v438_v2  ;;  %s414_s25 = scalar_lea.vmem %s342_s24, 2048  ;;  %p419_p1 = scmp.lt.s32.totalorder %s342_s24, %s342_s24 }
   0x8   :  { %p415_p0 = scmp.ne.s32.totalorder %s342_s24, %s414_s25  ;;  %p420_p2 = scmp.lt.s32.totalorder %s414_s25, %s414_s25 }
   0xa   :  { %p421_p3 = por %p420_p2, %p419_p1 }
   0xc   :  { %p422_p4 = pnand %p421_p3, %p415_p0 }
   0xe   :  { %361 = vmatmul.mubr.msk.bf16.gmra.mrb[4].mxu0 %vm65_vm0, %v411_v6  ;;  %365 = vmatmul.mubr.msk.bf16.gmra.mrb[4].mxu1 %vm65_vm0, %v411_v6 }
   0xf   :  { %130 = vmatprep.mubr.bf16.mxu0 %v438_v2  ;;  %203 = vmatprep.mubr.bf16.mxu1 %v438_v2 }
  0x16   :  { %362 = vmatmul.mubr.msk.bf16.gmra.mrb[8].mxu0 %vm65_vm0, %v412_v7  ;;  %366 = vmatmul.mubr.msk.bf16.gmra.mrb[8].mxu1 %vm65_vm0, %v412_v7 }
  0x17   :  { %140 = vmatprep.mubr.bf16.mxu0 %v438_v2  ;;  %213 = vmatprep.mubr.bf16.mxu1 %v438_v2 }
  0x1e   :  { %363 = vmatmul.mubr.msk.bf16.gmra.mrb[12].mxu0 %vm65_vm0, %v413_v8  ;;  %367 = vmatmul.mubr.msk.bf16.gmra.mrb[12].mxu1 %vm65_vm0, %v413_v8 }
  0xd9   :  { %v112_v9 = vpop.f32.mrb[0].mxu0  ;;  %v185_v10 = vpop.f32.mrb[0].mxu1 }
  0xda   :  { %v114_v11 = vpop.f32.mrb[1].mxu0  ;;  %v187_v12 = vpop.f32.mrb[1].mxu1 }
  0xdb   :  { %v384_v13 = vpack.c.bf16 %v114_v11, %v112_v9  ;;  %v385_v14 = vpack.c.bf16 %v187_v12, %v185_v10  ;;  %v116_v15 = vpop.f32.mrb[2].mxu0  ;;  %v189_v16 = vpop.f32.mrb[2].mxu1 }
  0xdc   :  { %v118_v17 = vpop.f32.mrb[3].mxu0  ;;  %v191_v18 = vpop.f32.mrb[3].mxu1 }
  0xdd   :  { %320 = vst [vmem:[#allocation2] sm:$0xff] %v384_v13  ;;  %321 = vst [vmem:[#allocation2 + $0x8] sm:$0xff] %v385_v14  ;;  %v386_v19 = vpack.c.bf16 %v118_v17, %v116_v15  ;;  %v387_v20 = vpack.c.bf16 %v191_v18, %v189_v16 }
  0xdf   :  { %322 = vst [vmem:[#allocation2 + $0x10] sm:$0xff] %v386_v19  ;;  %323 = vst [vmem:[#allocation2 + $0x18] sm:$0xff] %v387_v20 }
  0xe1   :  { %v122_v21 = vpop.f32.mrb[4].mxu0  ;;  %v195_v22 = vpop.f32.mrb[4].mxu1 }
  0xe2   :  { %v124_v23 = vpop.f32.mrb[5].mxu0  ;;  %v197_v24 = vpop.f32.mrb[5].mxu1 }
  0xe3   :  { %v388_v25 = vpack.c.bf16 %v124_v23, %v122_v21  ;;  %v389_v26 = vpack.c.bf16 %v197_v24, %v195_v22  ;;  %v126_v27 = vpop.f32.mrb[6].mxu0  ;;  %v199_v28 = vpop.f32.mrb[6].mxu1 }
  0xe4   :  { %v128_v29 = vpop.f32.mrb[7].mxu0  ;;  %v201_v30 = vpop.f32.mrb[7].mxu1 }
  0xe5   :  { %324 = vst [vmem:[#allocation2 + $0x20] sm:$0xff] %v388_v25  ;;  %325 = vst [vmem:[#allocation2 + $0x28] sm:$0xff] %v389_v26  ;;  %v390_v31 = vpack.c.bf16 %v128_v29, %v126_v27  ;;  %v391_v32 = vpack.c.bf16 %v201_v30, %v199_v28 }
  0xe7   :  { %326 = vst [vmem:[#allocation2 + $0x30] sm:$0xff] %v390_v31  ;;  %327 = vst [vmem:[#allocation2 + $0x38] sm:$0xff] %v391_v32 }
  0xe9   :  { %v132_v33 = vpop.f32.mrb[8].mxu0  ;;  %v205_v34 = vpop.f32.mrb[8].mxu1 }
  0xea   :  { %v134_v35 = vpop.f32.mrb[9].mxu0  ;;  %v207_v36 = vpop.f32.mrb[9].mxu1 }
  0xeb   :  { %v392_v37 = vpack.c.bf16 %v134_v35, %v132_v33  ;;  %v393_v38 = vpack.c.bf16 %v207_v36, %v205_v34  ;;  %v136_v39 = vpop.f32.mrb[10].mxu0  ;;  %v209_v40 = vpop.f32.mrb[10].mxu1 }
  0xec   :  { %v138_v41 = vpop.f32.mrb[11].mxu0  ;;  %v211_v42 = vpop.f32.mrb[11].mxu1 }
  0xed   :  { %328 = vst [vmem:[#allocation2 + $0x40] sm:$0xff] %v392_v37  ;;  %329 = vst [vmem:[#allocation2 + $0x48] sm:$0xff] %v393_v38  ;;  %v394_v43 = vpack.c.bf16 %v138_v41, %v136_v39  ;;  %v395_v44 = vpack.c.bf16 %v211_v42, %v209_v40 }
  0xef   :  { %330 = vst [vmem:[#allocation2 + $0x50] sm:$0xff] %v394_v43  ;;  %331 = vst [vmem:[#allocation2 + $0x58] sm:$0xff] %v395_v44 }
  0xf1   :  { %v142_v45 = vpop.f32.mrb[12].mxu0  ;;  %v215_v46 = vpop.f32.mrb[12].mxu1 }
  0xf2   :  { %v144_v47 = vpop.f32.mrb[13].mxu0  ;;  %v217_v48 = vpop.f32.mrb[13].mxu1 }
  0xf3   :  { %v396_v49 = vpack.c.bf16 %v144_v47, %v142_v45  ;;  %v397_v50 = vpack.c.bf16 %v217_v48, %v215_v46  ;;  %v146_v51 = vpop.f32.mrb[14].mxu0  ;;  %v219_v52 = vpop.f32.mrb[14].mxu1 }
  0xf4   :  { %v148_v53 = vpop.f32.mrb[15].mxu0  ;;  %v221_v54 = vpop.f32.mrb[15].mxu1 }
  0xf5   :  { %332 = vst [vmem:[#allocation2 + $0x60] sm:$0xff] %v396_v49  ;;  %333 = vst [vmem:[#allocation2 + $0x68] sm:$0xff] %v397_v50  ;;  %v398_v55 = vpack.c.bf16 %v148_v53, %v146_v51  ;;  %v399_v56 = vpack.c.bf16 %v221_v54, %v219_v52 }
  0xf7   :  { %334 = vst [vmem:[#allocation2 + $0x70] sm:$0xff] %v398_v55  ;;  %335 = vst [vmem:[#allocation2 + $0x78] sm:$0xff] %v399_v56 }
  0xf8   :  { %425 = shalt.err (!%p422_p4)
}
  0xf9   :  { %s426_s28 = scalar_lea.hbm %s503_s2, 2048 }
  0xfa   :  { %p427_p5 = scmp.ne.s32.totalorder %s503_s2, %s426_s28  ;;  %p430_p6 = scmp.lt.u32.totalorder %s426_s28, %s503_s2 }
  0xfc   :  { %p432_p7 = pnand %p430_p6, %p427_p5 }
  0xfe   :  { %435 = shalt.err (!%p432_p7)
}
  0xff   :  { %s440_s5 = smov 256   ;;  %s441_s6 = smov 16  }
 0x100   :  { %347 = dma.vmem_to_hbm [thread:$0]  %s342_s24, 2048, %s503_s2, [#allocation3], %s440_s5, %s440_s5, %s441_s6  }
 0x101   :  { %436 = dma.done.wait [#allocation3], 2048  }
 0x102   :  { %437 = vsyncadd [#allocation3], 4294965248 }
 0x103   :  { %351 = vsyncpa [#allocation3], 1 }

</bundles_post_ra>
